<compile_context>
chip_gen: v6e
topology: v6e:2x2x1
jax: 0.10.0
libtpu: 0.0.40
codegen_flags: <defaults>
</compile_context>

<pallas_src>
import jax
import jax.numpy as jnp
from jax.experimental import pallas as pl
from jax.experimental.pallas import tpu as pltpu

D_EMB = 446   # saprot_emb_dim (encoder logits feature dim)
H_OUT = 64    # protein_out_dim
T_OUT = 1     # target_dim
LN_EPS = 1e-5


def _round_up(x, m):
    return ((x + m - 1) // m) * m


def _pick_la_tile(la, le_pad):
    """Antigen-row tile so the matmul has ~512 M rows, capped by VMEM."""
    target_rows = 512
    tla = max(8, _round_up(max(1, target_rows // max(le_pad, 1)), 8))
    tla = min(tla, _round_up(la, 8))
    return tla


def _epi_compare_kernel(ag_ref, epi_ref, w1_ref, b1_ref, g_ref, beta_ref,
                        w2_ref, b2_ref, out_ref):
    # ag_ref   : [1, TLA, Dp]  f32   antigen logits tile (this batch, La tile)
    # epi_ref  : [1, Lep, Dp]  f32   full (padded) epitope logits for batch b
    # w1_ref   : [Dp, H]       bf16/f32 (transposed, zero-padded nn.Linear w)
    # b1/g/beta: [1, H]        f32
    # w2_ref   : [1, H]        f32   (target_dim == 1 row of the 2nd Linear)
    # b2_ref   : [1, 1]        f32
    # out_ref  : [1, TLA, Lep] f32   lane-dense output slab
    tla = ag_ref.shape[1]
    lep = epi_ref.shape[1]

    ag = ag_ref[0]                      # [TLA, Dp]
    epi = epi_ref[0]                    # [Lep, Dp]

    # Pairwise outer elementwise product, collapsed to the matmul M dim.
    # Row m = i * Lep + j  <->  (antigen i, epitope j).  Leading-dim collapse
    # with the minor (lane) dim unchanged is a cheap relayout.
    z = (ag[:, None, :] * epi[None, :, :]).reshape(tla * lep, ag.shape[-1])

    # Linear 1 on the MXU: bf16 inputs (cast here), f32 accumulation.
    w1 = w1_ref[...]
    h = jnp.dot(z.astype(w1.dtype), w1, preferred_element_type=jnp.float32)
    h = h + b1_ref[...]                                          # [M, H]

    # LayerNorm (one-pass stats: mean and E[h^2]), then affine + ReLU.
    hdim = h.shape[-1]
    inv_h = 1.0 / float(hdim)
    mu = jnp.sum(h, axis=-1, keepdims=True) * inv_h
    ex2 = jnp.sum(h * h, axis=-1, keepdims=True) * inv_h
    var = ex2 - mu * mu
    hn = (h - mu) * jax.lax.rsqrt(var + LN_EPS)
    hn = hn * g_ref[...] + beta_ref[...]
    hr = jnp.maximum(hn, 0.0)                                    # [M, H]

    # Linear 2 (out_dim == 1): VPU multiply + lane-axis reduce instead of an
    # N=1 MXU matmul; result is written as a lane-dense [TLA, Lep] slab.
    hr3 = hr.reshape(tla, lep, hdim)     # split leading dim (minor unchanged)
    o = jnp.sum(hr3 * w2_ref[...], axis=-1) + b2_ref[...]        # [TLA, Lep]
    out_ref[0] = o.astype(out_ref.dtype)


def saprot_epi_compare(ag_logits, epi_logits, params, *,
                       matmul_dtype=jnp.bfloat16):
    """ag_logits/epi_logits: [B, L_full, D_EMB] encoder logits (incl. CLS/EOS)."""
    ag = ag_logits[:, 1:-1, :].astype(jnp.float32)    # [B, La, D]
    epi = epi_logits[:, 1:-1, :].astype(jnp.float32)  # [B, Le, D]
    B, La, D = ag.shape
    _, Le, _ = epi.shape
    assert D == D_EMB

    # Pad feature dim 446 -> 512 (multiple of 128); pad Le to a sublane
    # multiple; pick / pad the La tile. Zero padding is exact: padded features
    # contribute 0 to the dot product and padded rows/cols are sliced off.
    D_pad = _round_up(D, 128)
    Le_pad = _round_up(Le, 8)
    TLA = _pick_la_tile(La, Le_pad)
    La_pad = _round_up(La, TLA)

    ag_p = jnp.zeros((B, La_pad, D_pad), jnp.float32).at[:, :La, :D].set(ag)
    epi_p = jnp.zeros((B, Le_pad, D_pad), jnp.float32).at[:, :Le, :D].set(epi)

    # PyTorch nn.Linear convention: weight [out, in], bias [out].
    w1_t = (jnp.zeros((D_pad, H_OUT), jnp.float32)
            .at[:D, :].set(jnp.transpose(params["w1"]))
            .astype(matmul_dtype))                                 # [Dp, H]
    b1 = params["b1"].reshape(1, H_OUT).astype(jnp.float32)
    gamma = params["ln_gamma"].reshape(1, H_OUT).astype(jnp.float32)
    beta = params["ln_beta"].reshape(1, H_OUT).astype(jnp.float32)
    w2 = params["w2"].reshape(1, H_OUT).astype(jnp.float32)       # T_OUT == 1
    b2 = params["b2"].reshape(1, 1).astype(jnp.float32)

    grid = (B, La_pad // TLA)

    flops = (2.0 * B * La_pad * Le_pad * D_pad * H_OUT          # Linear 1
             + 10.0 * B * La_pad * Le_pad * H_OUT)              # LN/ReLU/Linear 2
    bytes_accessed = (ag_p.size * 4 + epi_p.size * 4
                      + w1_t.size * w1_t.dtype.itemsize
                      + B * La_pad * Le_pad * 4)
    cost = pl.CostEstimate(flops=int(flops),
                           transcendentals=int(B * La_pad * Le_pad),
                           bytes_accessed=int(bytes_accessed))

    out = pl.pallas_call(
        _epi_compare_kernel,
        out_shape=jax.ShapeDtypeStruct((B, La_pad, Le_pad), jnp.float32),
        grid_spec=pltpu.PrefetchScalarGridSpec(
            num_scalar_prefetch=0,
            grid=grid,
            in_specs=[
                pl.BlockSpec((1, TLA, D_pad), lambda b, t: (b, t, 0)),
                pl.BlockSpec((1, Le_pad, D_pad), lambda b, t: (b, 0, 0)),
                pl.BlockSpec((D_pad, H_OUT), lambda b, t: (0, 0)),
                pl.BlockSpec((1, H_OUT), lambda b, t: (0, 0)),
                pl.BlockSpec((1, H_OUT), lambda b, t: (0, 0)),
                pl.BlockSpec((1, H_OUT), lambda b, t: (0, 0)),
                pl.BlockSpec((1, H_OUT), lambda b, t: (0, 0)),
                pl.BlockSpec((1, 1), lambda b, t: (0, 0)),
            ],
            out_specs=pl.BlockSpec((1, TLA, Le_pad), lambda b, t: (b, t, 0)),
        ),
        compiler_params=pltpu.CompilerParams(
            dimension_semantics=("parallel", "parallel")),
        cost_estimate=cost,
    )(ag_p, epi_p, w1_t, b1, gamma, beta, w2, b2)

    # Strip padding; restore the module's trailing target dim of 1.
    return out[:, :La, :Le, None]


def reference_forward(ag_logits, epi_logits, p):
    """Pure-JAX re-statement of the PyTorch forward (post-encoder)."""
    ag = ag_logits[:, 1:-1, :].astype(jnp.float32)
    epi = epi_logits[:, 1:-1, :].astype(jnp.float32)
    # z_mul -> transpose(1,3) -> transpose(1,2) == [B, La, Le, D]
    z = ag[:, :, None, :] * epi[:, None, :, :]
    h = jnp.einsum("blkd,hd->blkh", z, p["w1"],
                   precision=jax.lax.Precision.HIGHEST) + p["b1"]
    mu = h.mean(-1, keepdims=True)
    var = ((h - mu) ** 2).mean(-1, keepdims=True)
    hn = (h - mu) / jnp.sqrt(var + LN_EPS) * p["ln_gamma"] + p["ln_beta"]
    hr = jnp.maximum(hn, 0.0)
    return jnp.einsum("blkh,th->blkt", hr, p["w2"],
                      precision=jax.lax.Precision.HIGHEST) + p["b2"]


def init_params(key):
    k1, k2, k3, k4 = jax.random.split(key, 4)
    return {
        # PyTorch nn.Linear convention: weight [out, in], bias [out]
        "w1": 0.02 * jax.random.normal(k1, (H_OUT, D_EMB), jnp.float32),
        "b1": 0.01 * jax.random.normal(k2, (H_OUT,), jnp.float32),
        "ln_gamma": jnp.ones((H_OUT,), jnp.float32),
        "ln_beta": jnp.zeros((H_OUT,), jnp.float32),
        "w2": 0.02 * jax.random.normal(k3, (T_OUT, H_OUT), jnp.float32),
        "b2": 0.01 * jax.random.normal(k4, (T_OUT,), jnp.float32),
    }


if __name__ == "__main__":
    key = jax.random.PRNGKey(0)
    kp, ka, ke = jax.random.split(key, 3)
    params = init_params(kp)

    B = 2
    La_full, Le_full = 10, 10   # includes CLS/EOS -> La = Le = 8 after slicing
    ag_logits = jax.random.normal(ka, (B, La_full, D_EMB), jnp.float32)
    epi_logits = jax.random.normal(ke, (B, Le_full, D_EMB), jnp.float32)

    ref = reference_forward(ag_logits, epi_logits, params)

    # Default (perf) path: bf16 MXU inputs, f32 accumulation.
    out = saprot_epi_compare(ag_logits, epi_logits, params)
    out = jax.block_until_ready(out)
    assert out.shape == (B, La_full - 2, Le_full - 2, T_OUT), out.shape
    assert jnp.allclose(out, ref, rtol=1e-2, atol=1e-2), (
        float(jnp.max(jnp.abs(out - ref))))

    # f32 matmul variant: tight check against the HIGHEST-precision reference.
    out_f32 = saprot_epi_compare(ag_logits, epi_logits, params,
                                 matmul_dtype=jnp.float32)
    out_f32 = jax.block_until_ready(out_f32)
    assert jnp.allclose(out_f32, ref, rtol=2e-3, atol=2e-3), (
        float(jnp.max(jnp.abs(out_f32 - ref))))

    print("KERNEL_OK")
</pallas_src>

<mosaic_0001>
module attributes {stable_mosaic.version = 11 : i64} {
  func.func @_epi_compare_kernel(%arg0: i32, %arg1: i32, %arg2: memref<1x8x512xf32, #tpu.memory_space<vmem>>, %arg3: memref<1x8x512xf32, #tpu.memory_space<vmem>>, %arg4: memref<512x64xbf16, #tpu.memory_space<vmem>>, %arg5: memref<1x64xf32, #tpu.memory_space<vmem>>, %arg6: memref<1x64xf32, #tpu.memory_space<vmem>>, %arg7: memref<1x64xf32, #tpu.memory_space<vmem>>, %arg8: memref<1x64xf32, #tpu.memory_space<vmem>>, %arg9: memref<1x1xf32, #tpu.memory_space<vmem>>, %arg10: memref<1x8x8xf32, #tpu.memory_space<vmem>>) attributes {dimension_semantics = [#tpu.dimension_semantics<parallel>, #tpu.dimension_semantics<parallel>], iteration_bounds = array<i64: 2, 1>, scalar_prefetch = 0 : i64, scratch_operands = 0 : i64, tpu.core_type = #tpu.core_type<tc>, window_params = [{transform_indices = @transform_0, window_bounds = array<i64: 1, 8, 512>}, {transform_indices = @transform_1, window_bounds = array<i64: 1, 8, 512>}, {pipeline_mode = #tpu.pipeline_mode<synchronous>, transform_indices = @transform_2, window_bounds = array<i64: 512, 64>}, {pipeline_mode = #tpu.pipeline_mode<synchronous>, transform_indices = @transform_3, window_bounds = array<i64: 1, 64>}, {pipeline_mode = #tpu.pipeline_mode<synchronous>, transform_indices = @transform_4, window_bounds = array<i64: 1, 64>}, {pipeline_mode = #tpu.pipeline_mode<synchronous>, transform_indices = @transform_5, window_bounds = array<i64: 1, 64>}, {pipeline_mode = #tpu.pipeline_mode<synchronous>, transform_indices = @transform_6, window_bounds = array<i64: 1, 64>}, {pipeline_mode = #tpu.pipeline_mode<synchronous>, transform_indices = @transform_7, window_bounds = array<i64: 1, 1>}, {transform_indices = @transform_8, window_bounds = array<i64: 1, 8, 8>}]} {
    %c0 = arith.constant 0 : index
    %c0_0 = arith.constant 0 : index
    %c0_1 = arith.constant 0 : index
    %0 = vector.load %arg2[%c0, %c0_0, %c0_1] : memref<1x8x512xf32, #tpu.memory_space<vmem>>, vector<1x8x512xf32>
    %1 = vector.shape_cast %0 : vector<1x8x512xf32> to vector<8x512xf32>
    %c0_2 = arith.constant 0 : index
    %c0_3 = arith.constant 0 : index
    %c0_4 = arith.constant 0 : index
    %2 = vector.load %arg3[%c0_2, %c0_3, %c0_4] : memref<1x8x512xf32, #tpu.memory_space<vmem>>, vector<1x8x512xf32>
    %3 = vector.shape_cast %2 : vector<1x8x512xf32> to vector<8x512xf32>
    %4 = vector.shape_cast %1 : vector<8x512xf32> to vector<8x1x512xf32>
    %5 = vector.shape_cast %3 : vector<8x512xf32> to vector<1x8x512xf32>
    %6 = vector.broadcast %4 : vector<8x1x512xf32> to vector<8x8x512xf32>
    %7 = vector.broadcast %5 : vector<1x8x512xf32> to vector<8x8x512xf32>
    %8 = arith.mulf %6, %7 : vector<8x8x512xf32>
    %9 = vector.shape_cast %8 : vector<8x8x512xf32> to vector<64x512xf32>
    %c0_5 = arith.constant 0 : index
    %c0_6 = arith.constant 0 : index
    %10 = vector.load %arg4[%c0_5, %c0_6] : memref<512x64xbf16, #tpu.memory_space<vmem>>, vector<512x64xbf16>
    %11 = arith.truncf %9 : vector<64x512xf32> to vector<64x512xbf16>
    %cst = arith.constant dense<0.000000e+00> : vector<64x64xf32>
    %12 = tpu.matmul %11, %10, %cst {dimension_numbers = #tpu.dot_dimension_numbers<[1], [0], [0], [1], [0, 0, 1, 1], [], []>} : vector<64x512xbf16>, vector<512x64xbf16>, vector<64x64xf32> -> vector<64x64xf32>
    %c0_7 = arith.constant 0 : index
    %c0_8 = arith.constant 0 : index
    %13 = vector.load %arg5[%c0_7, %c0_8] : memref<1x64xf32, #tpu.memory_space<vmem>>, vector<1x64xf32>
    %14 = vector.broadcast %13 : vector<1x64xf32> to vector<64x64xf32>
    %15 = arith.addf %12, %14 : vector<64x64xf32>
    %cst_9 = arith.constant dense<0.000000e+00> : vector<64xf32>
    %16 = vector.multi_reduction <add>, %15, %cst_9 [1] : vector<64x64xf32> to vector<64xf32>
    %17 = vector.shape_cast %16 : vector<64xf32> to vector<64x1xf32>
    %cst_10 = arith.constant 1.562500e-02 : f32
    %18 = vector.broadcast %cst_10 : f32 to vector<64x1xf32>
    %19 = arith.mulf %17, %18 : vector<64x1xf32>
    %20 = arith.mulf %15, %15 : vector<64x64xf32>
    %cst_11 = arith.constant dense<0.000000e+00> : vector<64xf32>
    %21 = vector.multi_reduction <add>, %20, %cst_11 [1] : vector<64x64xf32> to vector<64xf32>
    %22 = vector.shape_cast %21 : vector<64xf32> to vector<64x1xf32>
    %cst_12 = arith.constant 1.562500e-02 : f32
    %23 = vector.broadcast %cst_12 : f32 to vector<64x1xf32>
    %24 = arith.mulf %22, %23 : vector<64x1xf32>
    %25 = arith.mulf %19, %19 : vector<64x1xf32>
    %26 = arith.subf %24, %25 : vector<64x1xf32>
    %27 = vector.broadcast %19 : vector<64x1xf32> to vector<64x64xf32>
    %28 = arith.subf %15, %27 : vector<64x64xf32>
    %cst_13 = arith.constant 9.99999974E-6 : f32
    %29 = vector.broadcast %cst_13 : f32 to vector<64x1xf32>
    %30 = arith.addf %26, %29 : vector<64x1xf32>
    %31 = math.rsqrt %30 : vector<64x1xf32>
    %32 = vector.broadcast %31 : vector<64x1xf32> to vector<64x64xf32>
    %33 = arith.mulf %28, %32 : vector<64x64xf32>
    %c0_14 = arith.constant 0 : index
    %c0_15 = arith.constant 0 : index
    %34 = vector.load %arg6[%c0_14, %c0_15] : memref<1x64xf32, #tpu.memory_space<vmem>>, vector<1x64xf32>
    %35 = vector.broadcast %34 : vector<1x64xf32> to vector<64x64xf32>
    %36 = arith.mulf %33, %35 : vector<64x64xf32>
    %c0_16 = arith.constant 0 : index
    %c0_17 = arith.constant 0 : index
    %37 = vector.load %arg7[%c0_16, %c0_17] : memref<1x64xf32, #tpu.memory_space<vmem>>, vector<1x64xf32>
    %38 = vector.broadcast %37 : vector<1x64xf32> to vector<64x64xf32>
    %39 = arith.addf %36, %38 : vector<64x64xf32>
    %cst_18 = arith.constant 0.000000e+00 : f32
    %40 = vector.broadcast %cst_18 : f32 to vector<64x64xf32>
    %41 = arith.maximumf %39, %40 : vector<64x64xf32>
    %42 = vector.shape_cast %41 : vector<64x64xf32> to vector<8x8x64xf32>
    %c0_19 = arith.constant 0 : index
    %c0_20 = arith.constant 0 : index
    %43 = vector.load %arg8[%c0_19, %c0_20] : memref<1x64xf32, #tpu.memory_space<vmem>>, vector<1x64xf32>
    %44 = vector.shape_cast %43 : vector<1x64xf32> to vector<1x1x64xf32>
    %45 = vector.broadcast %44 : vector<1x1x64xf32> to vector<8x8x64xf32>
    %46 = arith.mulf %42, %45 : vector<8x8x64xf32>
    %cst_21 = arith.constant dense<0.000000e+00> : vector<8x8xf32>
    %47 = vector.multi_reduction <add>, %46, %cst_21 [2] : vector<8x8x64xf32> to vector<8x8xf32>
    %c0_22 = arith.constant 0 : index
    %c0_23 = arith.constant 0 : index
    %48 = vector.load %arg9[%c0_22, %c0_23] : memref<1x1xf32, #tpu.memory_space<vmem>>, vector<1x1xf32>
    %49 = vector.broadcast %48 : vector<1x1xf32> to vector<8x8xf32>
    %50 = arith.addf %47, %49 : vector<8x8xf32>
    %c0_24 = arith.constant 0 : index
    %c0_25 = arith.constant 0 : index
    %c0_26 = arith.constant 0 : index
    %51 = vector.load %arg10[%c0_24, %c0_25, %c0_26] : memref<1x8x8xf32, #tpu.memory_space<vmem>>, vector<1x8x8xf32>
    %52 = vector.shape_cast %51 : vector<1x8x8xf32> to vector<8x8xf32>
    %53 = vector.shape_cast %50 : vector<8x8xf32> to vector<1x8x8xf32>
    tpu.vector_store %arg10[%c0_24, %c0_25, %c0_26], %53 {strides = array<i32>} : memref<1x8x8xf32, #tpu.memory_space<vmem>>, vector<1x8x8xf32>,
    return
  }
  func.func @transform_0(%arg0: i32, %arg1: i32) -> (i32, i32, i32) {
    %c0_i32 = arith.constant 0 : i32
    %c0_i32_0 = arith.constant 0 : i32
    return %arg0, %arg1, %c0_i32 : i32, i32, i32
  }
  func.func @transform_1(%arg0: i32, %arg1: i32) -> (i32, i32, i32) {
    %c0_i32 = arith.constant 0 : i32
    %c0_i32_0 = arith.constant 0 : i32
    %c0_i32_1 = arith.constant 0 : i32
    return %arg0, %c0_i32, %c0_i32_0 : i32, i32, i32
  }
  func.func @transform_2(%arg0: i32, %arg1: i32) -> (i32, i32) {
    %c0_i32 = arith.constant 0 : i32
    %c0_i32_0 = arith.constant 0 : i32
    %c0_i32_1 = arith.constant 0 : i32
    return %c0_i32, %c0_i32_0 : i32, i32
  }
  func.func @transform_3(%arg0: i32, %arg1: i32) -> (i32, i32) {
    %c0_i32 = arith.constant 0 : i32
    %c0_i32_0 = arith.constant 0 : i32
    %c0_i32_1 = arith.constant 0 : i32
    return %c0_i32, %c0_i32_0 : i32, i32
  }
  func.func @transform_4(%arg0: i32, %arg1: i32) -> (i32, i32) {
    %c0_i32 = arith.constant 0 : i32
    %c0_i32_0 = arith.constant 0 : i32
    %c0_i32_1 = arith.constant 0 : i32
    return %c0_i32, %c0_i32_0 : i32, i32
  }
  func.func @transform_5(%arg0: i32, %arg1: i32) -> (i32, i32) {
    %c0_i32 = arith.constant 0 : i32
    %c0_i32_0 = arith.constant 0 : i32
    %c0_i32_1 = arith.constant 0 : i32
    return %c0_i32, %c0_i32_0 : i32, i32
  }
  func.func @transform_6(%arg0: i32, %arg1: i32) -> (i32, i32) {
    %c0_i32 = arith.constant 0 : i32
    %c0_i32_0 = arith.constant 0 : i32
    %c0_i32_1 = arith.constant 0 : i32
    return %c0_i32, %c0_i32_0 : i32, i32
  }
  func.func @transform_7(%arg0: i32, %arg1: i32) -> (i32, i32) {
    %c0_i32 = arith.constant 0 : i32
    %c0_i32_0 = arith.constant 0 : i32
    %c0_i32_1 = arith.constant 0 : i32
    return %c0_i32, %c0_i32_0 : i32, i32
  }
  func.func @transform_8(%arg0: i32, %arg1: i32) -> (i32, i32, i32) {
    %c0_i32 = arith.constant 0 : i32
    %c0_i32_0 = arith.constant 0 : i32
    return %arg0, %arg1, %c0_i32 : i32, i32, i32
  }
}

</mosaic_0001>

<bundles_post_ra>
// kernel: tpu_custom_call.1
= control target key start
LH: loop header
LB: loop body
LE: loop exit
PB: predicated region body
PF: predicated region fallthrough
CT: control target
= control target key end

     0   :  { %s2258_s0 = inlined_call_operand.vmem [shape: f32[2,8,512], index: 0, kind: input, shape index: {}]   ;;  %s2259_s1 = inlined_call_operand.vmem [shape: f32[2,8,512], index: 1, kind: input, shape index: {}]   ;;  %s2260_s2 = inlined_call_operand.vmem [shape: bf16[512,64], index: 2, kind: input, shape index: {}]   ;;  %s2261_s3 = inlined_call_operand.vmem [shape: f32[1,64], index: 3, kind: input, shape index: {}]   ;;  %s2262_s4 = inlined_call_operand.vmem [shape: f32[1,64], index: 4, kind: input, shape index: {}]   ;;  %s2263_s5 = inlined_call_operand.vmem [shape: f32[1,64], index: 5, kind: input, shape index: {}]   ;;  %s2264_s6 = inlined_call_operand.vmem [shape: f32[1,64], index: 6, kind: input, shape index: {}]   ;;  %s2265_s7 = inlined_call_operand.<no memory space> [shape: f32[1,1], index: 7, kind: input, shape index: {}]   ;;  %s2266_s8 = inlined_call_operand.hbm [shape: f32[2,8,8], index: 8, kind: output, shape index: {}]  }
   0x1   :  { %v13_v0 = vstv %s2265_s7 }
   0x2   :  { %14 = vst [vmem:[#allocation2] sm:$0x1] %v13_v0 }
   0x3   :  { %15 = vsyncpa [#allocation4], 0 }
   0x4   :  { %17 = vsyncpa [#allocation4 + $0x1], 0  ;;  %s1789_s29 = smov 0   ;;  %s1791_s30 = smov 0  }
   0x5   :  { %s1793_s9 = smov 0   ;;  %s1795_s10 = smov 0  }
   0x6   :  { %s1797_s11 = smov 0   ;;  %s1799_s12 = smov 0  }
   0x7 LB: > { %s1415_s7 = sadd.s32 4294967295, %s1736_s12   ;;  %s1416_s13 = sadd.s32 4294967294, %s1736_s12   ;;  %s1736_s12 = sphi %s1799_s12, %s23_s12   ;;  %s1732_s11 = sphi %s1797_s11, %s2273_s11   ;;  %s1728_s10 = sphi %s1795_s10, %s2272_s10   ;;  %s1724_s9 = sphi %s1793_s9, %s2271_s9   ;;  %s1720_s30 = sphi %s1791_s30, %s2270_s30   ;;  %s1716_s29 = sphi %s1789_s29, %s2269_s29  }
   0x8   : > { %s35_s14 = sadd.s32 1, %s1732_s11  ;;  %s224_s15 = sadd.s32 1, %s1724_s9 }
   0x9   : > { %p37_p0 = scmp.ge.s32.totalorder %s35_s14, 2  ;;  %p234_p1 = scmp.ne.s32.totalorder %s1724_s9, %s1720_s30 }
   0xa   : > { %p235_p2 = scmp.eq.s32.totalorder %s1415_s7, 1  ;;  %p240_p3 = scmp.ne.s32.totalorder %s1720_s30, %s1716_s29 }
   0xb   : > { %s2275_s14 = smov (%p37_p0, %s35_s14), 0  ;;  %p241_p5 = scmp.eq.s32.totalorder %s1416_s13, 1 }
   0xc   : > { %p1829_p4 = por %p235_p2, %p234_p1  ;;  %s219_s17 = ssub.s32 %s1732_s11, %s2275_s14 }
   0xd   : > { %p1419_p6 = scmp.ge.s32.totalorder %s1736_s12, 1  ;;  %p222_p7 = scmp.eq.s32.totalorder %s219_s17, 0 }
   0xe   : > { %p1836_p8 = por %p241_p5, %p240_p3  ;;  %p297_p9 = scmp.lt.s32.totalorder %s1736_s12, 3 }
   0xf   : > { %s1842_s19 = scalar_select %p222_p7, %s1724_s9, %s224_s15  }
  0x10   : > { %p298_p10 = pnand %p1419_p6, %p297_p9 }
  0x11   : > { %p340_p11 = scmp.lt.s32.totalorder (!%p298_p10), %s1728_s10, 1  ;;  %s337_s23 = sand.u32 (!%p298_p10), 1, %s1720_s30  }
  0x12   : > { %301 = sbr.rel (%p298_p10) target bundleno = 630 (0x276), region = 52  ;;  %s1463_s24 = sshll.u32 (!%p298_p10), %s1728_s10, 7 }
  0x13   : > { %s2216_s7 = scalar_lea.hbm (!%p298_p10), %s2266_s8, %s1463_s24  ;;  %s1740_s17 = smov (!%p298_p10), [#allocation3]  }
  0x14   : > { %s1664_s20 = sshll.u32 (!%p298_p10), %s1740_s17, 4  ;;  %s1665_s20 = int_to_ptr.vmem [resolvable:$false] %s1664_s20 }
  0x15   : > { %s1666_s21 = scalar_lea.vmem (!%p298_p10), %s1665_s20, 256 }
  0x17   : > { %v1606_v1 = vld [vmem:[%s2260_s2 + $0x78] sm:$0xff]   ;;  %v1610_v5 = vld [vmem:[%s2260_s2 + $0x70] sm:$0xff]   ;;  %v1614_v9 = vld [vmem:[%s2260_s2 + $0x68] sm:$0xff]   ;;  %s1921_s15 = scalar_select %p340_p11, %s1728_s10, 1  ;;  %v374_v31 = vlaneseq  ;;  %v1738_v34 = vmov 1966171168  }
  0x18   : > { %v1607_v2 = vld [vmem:[%s2260_s2 + $0xf8] sm:$0xff]   ;;  %1468 = vmatprep.subr.bf16.mxu0 %v1606_v1  ;;  %v1611_v6 = vld [vmem:[%s2260_s2 + $0xf0] sm:$0xff]   ;;  %v1615_v10 = vld [vmem:[%s2260_s2 + $0xe8] sm:$0xff]   ;;  %v372_v35 = vunpack.c.l.s4 %v1738_v34  ;;  %vm1036_vm0 = vcmask 523264   ;;  %vm1294_vm1 = vcmask 1041409   ;;  %vm1296_vm2 = vcmask 1042434  }
  0x19   : > { %v1608_v3 = vld [vmem:[%s2260_s2 + $0x38] sm:$0xff]   ;;  %1508 = vmatprep.subr.bf16.mxu1 %v1607_v2  ;;  %v1612_v7 = vld [vmem:[%s2260_s2 + $0x30] sm:$0xff]   ;;  %v1616_v11 = vld [vmem:[%s2260_s2 + $0x28] sm:$0xff]   ;;  %s1466_s27 = sshll.u32 %s1921_s15, 5  ;;  %v1949_v36 = vshrl.u32 %v374_v31, 7  ;;  %vm1298_vm3 = vcmask 1043459  }
  0x1a   : > { %v1609_v4 = vld [vmem:[%s2260_s2 + $0xb8] sm:$0xff]   ;;  %1469 = vmatpush3.bf16.msra.mxu0 %v1608_v3  ;;  %v1613_v8 = vld [vmem:[%s2260_s2 + $0xb0] sm:$0xff]   ;;  %v1617_v12 = vld [vmem:[%s2260_s2 + $0xa8] sm:$0xff]   ;;  %s348_s15 = scalar_lea.vmem %s2258_s0, %s1466_s27  ;;  %v373_v41 = vunpack.c.0.s8 %v372_v35  ;;  %s353_s26 = scalar_lea.vmem %s2259_s1, %s1466_s27  ;;  %vm1300_vm4 = vcmask 1044484   ;;  %vm1302_vm5 = vcmask 1045509   ;;  %vm1304_vm6 = vcmask 1046534  }
  0x1b   : > { %1509 = vmatpush3.bf16.msra.mxu1 %v1609_v4  ;;  %1470 = vmatprep.subr.bf16.mxu0 %v1610_v5  ;;  %v1618_v13 = vld [vmem:[%s2260_s2 + $0x60] sm:$0xff]   ;;  %v1622_v17 = vld [vmem:[%s2260_s2 + $0x58] sm:$0xff]   ;;  %v1626_v21 = vld [vmem:[%s2260_s2 + $0x50] sm:$0xff]   ;;  %v1953_v47 = vsub.s32 1, %v1949_v36  ;;  %v1956_v48 = vsub.s32 3, %v1949_v36  ;;  %v1962_v53 = vsub.s32 0, %v1949_v36 }
  0x1c   : > { %1510 = vmatprep.subr.bf16.mxu1 %v1611_v6  ;;  %v1619_v14 = vld [vmem:[%s2260_s2 + $0xe0] sm:$0xff]   ;;  %v1623_v18 = vld [vmem:[%s2260_s2 + $0xd8] sm:$0xff]   ;;  %v1627_v22 = vld [vmem:[%s2260_s2 + $0xd0] sm:$0xff]   ;;  %v376_v42 = vsub.s32 %v373_v41, %v1949_v36  ;;  %v1965_v54 = vsub.s32 2, %v1949_v36  ;;  %vm1306_vm7 = vcmask 1047559   ;;  %vm1309_vm8 = vcmask 64512  }
  0x1d   : > { %v1620_v15 = vld [vmem:[%s2260_s2 + $0x20] sm:$0xff]   ;;  %v1624_v19 = vld [vmem:[%s2260_s2 + $0x18] sm:$0xff]   ;;  %v1628_v23 = vld [vmem:[%s2260_s2 + $0x10] sm:$0xff]   ;;  %s1312_s10 = scalar_lea.sflag [#allocation4], %s337_s23 }
  0x1e   : > { %1471 = vmatpush3.bf16.msra.mxu0 %v1612_v7  ;;  %v1621_v16 = vld [vmem:[%s2260_s2 + $0xa0] sm:$0xff]   ;;  %v1625_v20 = vld [vmem:[%s2260_s2 + $0x98] sm:$0xff]   ;;  %v1629_v24 = vld [vmem:[%s2260_s2 + $0x90] sm:$0xff]  }
  0x1f   : > { %1511 = vmatpush3.bf16.msra.mxu1 %v1613_v8  ;;  %1472 = vmatprep.subr.bf16.mxu0 %v1614_v9  ;;  %v1630_v25 = vld [vmem:[%s2260_s2 + $0x48] sm:$0xff]   ;;  %v1634_v29 = vld [vmem:[%s2260_s2 + $0x40] sm:$0xff]   ;;  %v1641_v39 = vld [vmem:[%s348_s15 + $0x10] ss:$8 sps:$4 sm:$0xff]  }
  0x20   : > { %1512 = vmatprep.subr.bf16.mxu1 %v1615_v10  ;;  %v1631_v26 = vld [vmem:[%s2260_s2 + $0xc8] sm:$0xff]   ;;  %v1635_v30 = vld [vmem:[%s2260_s2 + $0xc0] sm:$0xff]   ;;  %v1643_v40 = vld [vmem:[%s348_s15 + $0x14] ss:$8 sps:$4 sm:$0xff]   ;;  %v391_v44 = vrot.slane %v1641_v39, %v376_v42 }
  0x21   : > { %v1632_v27 = vld [vmem:[%s2260_s2 + $0x8] sm:$0xff]   ;;  %v1636_v32 = vld [vmem:[%s2260_s2] sm:$0xff]   ;;  %v398_v46 = vrot.slane %v1643_v40, %v376_v42  ;;  %v1969_v58 = vld [vmem:[%s353_s26 + $0x18] sm:$0xff] }
  0x22   : > { %1473 = vmatpush3.bf16.msra.mxu0 %v1616_v11  ;;  %v1633_v28 = vld [vmem:[%s2260_s2 + $0x88] sm:$0xff]   ;;  %v1637_v33 = vld [vmem:[%s2260_s2 + $0x80] sm:$0xff]   ;;  %v1981_v2 = vld [vmem:[%s353_s26 + $0x10] sm:$0xff] }
  0x23   : > { %1513 = vmatpush3.bf16.msra.mxu1 %v1617_v12  ;;  %1474 = vmatprep.subr.bf16.mxu0 %v1618_v13  ;;  %v1638_v37 = vld [vmem:[%s348_s15] ss:$8 sps:$4 sm:$0xff]   ;;  %v1640_v38 = vld [vmem:[%s348_s15 + $0x4] ss:$8 sps:$4 sm:$0xff]   ;;  %s2209_s15 = sshll.u32 %s337_s23, 3 }
  0x24   : > { %1514 = vmatprep.subr.bf16.mxu1 %v1619_v14  ;;  %v377_v43 = vrot.slane %v1638_v37, %v376_v42  ;;  %v384_v45 = vrot.slane %v1640_v38, %v376_v42  ;;  %v1967_v57 = vld [vmem:[%s353_s26 + $0x8] sm:$0xff]  ;;  %v1979_v1 = vld [vmem:[%s353_s26] sm:$0xff]  ;;  %s339_s25 = scalar_lea.vmem [#allocation3], %s2209_s15 }
  0x25   : > { %s1326_s26 = sshll.u32 %s339_s25, 4  ;;  %s1327_s26 = int_to_ptr.vmem [resolvable:$true] %s1326_s26 }
  0x26   : > { %1475 = vmatpush3.bf16.msra.mxu0 %v1620_v15  ;;  %v399_v49 = vcombine.low %v377_v43, %v391_v44  ;;  %v400_v50 = vcombine.high %v377_v43, %v391_v44  ;;  %v401_v51 = vcombine.low %v384_v45, %v398_v46  ;;  %v402_v52 = vcombine.high %v384_v45, %v398_v46  ;;  %s1660_s13 = scalar_lea.vmem %s1327_s26, 128  ;;  %p1667_p1 = scmp.lt.s32.totalorder %s1327_s26, %s1665_s20 }
  0x27   : > { %1515 = vmatpush3.bf16.msra.mxu1 %v1621_v16  ;;  %1476 = vmatprep.subr.bf16.mxu0 %v1622_v17  ;;  %p1661_p12 = scmp.ne.s32.totalorder %s1327_s26, %s1660_s13  ;;  %p1668_p2 = scmp.lt.s32.totalorder %s1666_s21, %s1660_s13 }
  0x28   : > { %1516 = vmatprep.subr.bf16.mxu1 %v1623_v18  ;;  %v409_v55 = vrot.slane %v399_v49, %v376_v42  ;;  %v423_v56 = vrot.slane %v400_v50, %v376_v42  ;;  %v1971_v59 = vrot.slane %v401_v51, %v376_v42  ;;  %v1973_v60 = vrot.slane %v402_v52, %v376_v42 }
  0x29   : > { %p1662_p13 = pnand %p1661_p12, %p1829_p4  ;;  %p1669_p3 = por %p1668_p2, %p1667_p1 }
  0x2a   : > { %1477 = vmatpush3.bf16.msra.mxu0 %v1624_v19  ;;  %v442_v61 = vrot.slane %v409_v55, %v1953_v47  ;;  %v458_v62 = vrot.slane %v423_v56, %v1953_v47  ;;  %v450_v63 = vrot.slane %v409_v55, %v1956_v48  ;;  %v466_v0 = vrot.slane %v423_v56, %v1956_v48 }
  0x2b   : > { %1517 = vmatpush3.bf16.msra.mxu1 %v1625_v20  ;;  %1478 = vmatprep.subr.bf16.mxu0 %v1626_v21  ;;  %v438_v3 = vrot.slane %v409_v55, %v1962_v53  ;;  %v454_v4 = vrot.slane %v423_v56, %v1962_v53  ;;  %v446_v5 = vrot.slane %v409_v55, %v1965_v54  ;;  %p1663_p0 = pneg %p1662_p13 }
  0x2c   : > { %1518 = vmatprep.subr.bf16.mxu1 %v1627_v22  ;;  %v462_v6 = vrot.slane %v423_v56, %v1965_v54  ;;  %v596_v7 = vmul.f32 %v442_v61, %v1967_v57  ;;  %v600_v8 = vmul.f32 %v458_v62, %v1967_v57  ;;  %v598_v9 = vmul.f32 %v450_v63, %v1969_v58 }
  0x2d   : > { %v602_v10 = vmul.f32 %v466_v0, %v1969_v58  ;;  %v595_v11 = vmul.f32 %v438_v3, %v1979_v1  ;;  %v599_v12 = vmul.f32 %v454_v4, %v1979_v1  ;;  %v597_v13 = vmul.f32 %v446_v5, %v1981_v2  ;;  %p1670_p5 = pnand %p1669_p3, %p1663_p0 }
  0x2e   : > { %1479 = vmatpush3.bf16.msra.mxu0 %v1628_v23  ;;  %v601_v14 = vmul.f32 %v462_v6, %v1981_v2  ;;  %v692_v15 = vpack.c.bf16 %v600_v8, %v596_v7  ;;  %v431_v17 = vcombine.high %v409_v55, %v409_v55  ;;  %v433_v18 = vcombine.high %v423_v56, %v423_v56 }
  0x2f   : > { %1519 = vmatpush3.bf16.msra.mxu1 %v1629_v24  ;;  %1480 = vmatprep.subr.bf16.mxu0 %v1630_v25  ;;  %v694_v16 = vpack.c.bf16 %v602_v10, %v598_v9  ;;  %v691_v19 = vpack.c.bf16 %v599_v12, %v595_v11  ;;  %v506_v21 = vrot.slane %v1971_v59, %v1953_v47 }
  0x30   : > { %1520 = vmatprep.subr.bf16.mxu1 %v1631_v26  ;;  %v693_v20 = vpack.c.bf16 %v601_v14, %v597_v13  ;;  %v522_v22 = vrot.slane %v1973_v60, %v1953_v47  ;;  %938 = vmatprep.mubr.bf16.mxu0 %v692_v15  ;;  %v474_v23 = vrot.slane %v431_v17, %v1953_v47 }
  0x31   : > { %1003 = vmatprep.mubr.bf16.mxu1 %v694_v16  ;;  %v490_v24 = vrot.slane %v433_v18, %v1953_v47  ;;  %v482_v25 = vrot.slane %v431_v17, %v1956_v48  ;;  %v498_v26 = vrot.slane %v433_v18, %v1956_v48  ;;  %v494_v38 = vrot.slane %v433_v18, %v1965_v54 }
  0x32   : > { %1481 = vmatpush3.bf16.msra.mxu0 %v1632_v27  ;;  %v470_v27 = vrot.slane %v431_v17, %v1962_v53  ;;  %v612_v41 = vmul.f32 %v506_v21, %v1967_v57  ;;  %v616_v42 = vmul.f32 %v522_v22, %v1967_v57  ;;  %v514_v46 = vrot.slane %v1971_v59, %v1956_v48 }
  0x33   : > { %1521 = vmatpush3.bf16.msra.mxu1 %v1633_v28  ;;  %1482 = vmatprep.subr.bf16.mxu0 %v1634_v29  ;;  %v486_v28 = vrot.slane %v433_v18, %v1962_v53  ;;  %v604_v29 = vmul.f32 %v474_v23, %v1967_v57  ;;  %v610_v34 = vmul.f32 %v498_v26, %v1969_v58 }
  0x34   : > { %1522 = vmatprep.subr.bf16.mxu1 %v1635_v30  ;;  %v608_v30 = vmul.f32 %v490_v24, %v1967_v57  ;;  %v603_v35 = vmul.f32 %v470_v27, %v1979_v1  ;;  %v609_v45 = vmul.f32 %v494_v38, %v1981_v2  ;;  %v700_v49 = vpack.c.bf16 %v616_v42, %v612_v41 }
  0x35   : > { %v607_v37 = vmul.f32 %v486_v28, %v1979_v1  ;;  %v530_v50 = vrot.slane %v1973_v60, %v1956_v48  ;;  %v502_v51 = vrot.slane %v1971_v59, %v1962_v53  ;;  %v518_v52 = vrot.slane %v1973_v60, %v1962_v53 }
  0x36   : > { %1483 = vmatpush3.bf16.msra.mxu0 %v1636_v32  ;;  %v606_v32 = vmul.f32 %v482_v25, %v1969_v58  ;;  %v696_v39 = vpack.c.bf16 %v608_v30, %v604_v29  ;;  %v614_v56 = vmul.f32 %v514_v46, %v1969_v58  ;;  %v510_v61 = vrot.slane %v1971_v59, %v1965_v54  ;;  %v2058_v25 = vld [vmem:[%s2261_s3] ss:$0 sm:$0xff] }
  0x37   : > { %1523 = vmatpush3.bf16.msra.mxu1 %v1637_v33  ;;  %v478_v33 = vrot.slane %v431_v17, %v1965_v54  ;;  %v695_v44 = vpack.c.bf16 %v607_v37, %v603_v35  ;;  %v526_v62 = vrot.slane %v1973_v60, %v1965_v54  ;;  %v618_v63 = vmul.f32 %v530_v50, %v1969_v58 }
  0x38   : > { %v698_v43 = vpack.c.bf16 %v610_v34, %v606_v32  ;;  %v611_v0 = vmul.f32 %v502_v51, %v1979_v1  ;;  %v615_v3 = vmul.f32 %v518_v52, %v1979_v1  ;;  %v432_v4 = vcombine.high %v1971_v59, %v1971_v59 }
  0x39   : > { %939 = vmatmul.mubr.bf16.vlgmr.msra.gmra.mxu0 %v691_v19  ;;  %v605_v40 = vmul.f32 %v478_v33, %v1981_v2  ;;  %v613_v5 = vmul.f32 %v510_v61, %v1981_v2  ;;  %v617_v6 = vmul.f32 %v526_v62, %v1981_v2  ;;  %v434_v7 = vcombine.high %v1973_v60, %v1973_v60 }
  0x3a   : > { %1004 = vmatmul.mubr.bf16.vlgmr.msra.gmra.mxu1 %v693_v20  ;;  %946 = vmatprep.mubr.bf16.mxu0 %v696_v39  ;;  %v702_v8 = vpack.c.bf16 %v618_v63, %v614_v56  ;;  %v538_v9 = vrot.slane %v432_v4, %v1953_v47  ;;  %v546_v10 = vrot.slane %v432_v4, %v1956_v48 }
  0x3b   : > { %1011 = vmatprep.mubr.bf16.mxu1 %v698_v43  ;;  %v697_v55 = vpack.c.bf16 %v609_v45, %v605_v40  ;;  %v699_v11 = vpack.c.bf16 %v615_v3, %v611_v0  ;;  %v701_v12 = vpack.c.bf16 %v617_v6, %v613_v5  ;;  %v554_v13 = vrot.slane %v434_v7, %v1953_v47 }
  0x3c   : > { %v562_v59 = vrot.slane %v434_v7, %v1956_v48  ;;  %v620_v14 = vmul.f32 %v538_v9, %v1967_v57  ;;  %v622_v15 = vmul.f32 %v546_v10, %v1969_v58  ;;  %v534_v16 = vrot.slane %v432_v4, %v1962_v53 }
  0x3d   : > { %v550_v60 = vrot.slane %v434_v7, %v1962_v53  ;;  %v624_v17 = vmul.f32 %v554_v13, %v1967_v57  ;;  %v542_v19 = vrot.slane %v432_v4, %v1965_v54  ;;  %v558_v20 = vrot.slane %v434_v7, %v1965_v54 }
  0x3e   : > { %v626_v18 = vmul.f32 %v562_v59, %v1969_v58  ;;  %v619_v48 = vmul.f32 %v534_v16, %v1979_v1 }
  0x3f   : > { %v704_v47 = vpack.c.bf16 %v624_v17, %v620_v14  ;;  %v623_v22 = vmul.f32 %v550_v60, %v1979_v1  ;;  %v621_v23 = vmul.f32 %v542_v19, %v1981_v2  ;;  %v625_v53 = vmul.f32 %v558_v20, %v1981_v2 }
  0x40   : > { %v706_v21 = vpack.c.bf16 %v626_v18, %v622_v15 }
  0x41   : > { %947 = vmatmul.mubr.bf16.gmra.mxu0 %v695_v44  ;;  %v703_v57 = vpack.c.bf16 %v623_v22, %v619_v48  ;;  %v705_v58 = vpack.c.bf16 %v625_v53, %v621_v23 }
  0x42   : > { %1012 = vmatmul.mubr.bf16.gmra.mxu1 %v697_v55  ;;  %954 = vmatprep.mubr.bf16.mxu0 %v700_v49 }
  0x43   : > { %1019 = vmatprep.mubr.bf16.mxu1 %v702_v8 }
  0x49   : > { %955 = vmatmul.mubr.bf16.gmra.mxu0 %v699_v11 }
  0x4a   : > { %1020 = vmatmul.mubr.bf16.gmra.mxu1 %v701_v12  ;;  %962 = vmatprep.mubr.bf16.mxu0 %v704_v47 }
  0x4b   : > { %1027 = vmatprep.mubr.bf16.mxu1 %v706_v21 }
  0x51   : > { %963 = vmatmul.mubr.bf16.gmra.mxu0 %v703_v57 }
  0x52   : > { %1028 = vmatmul.mubr.bf16.gmra.mxu1 %v705_v58 }
  0xf9   : > { %v1484_v24 = vpop.f32.mrf.mxu0 }
  0xfa   : > { %v1524_v54 = vpop.f32.mrf.mxu1 }
  0xfb   : > { %v1485_v26 = vpop.f32.mrf.mxu0 }
  0xfc   : > { %v1525_v27 = vpop.f32.mrf.mxu1  ;;  %v1486_v1 = vadd.f32 %v1485_v26, %v1484_v24 }
  0xfd   : > { %v1487_v28 = vpop.f32.mrf.mxu0  ;;  %v1526_v30 = vadd.f32 %v1525_v27, %v1524_v54 }
  0xfe   : > { %v1527_v29 = vpop.f32.mrf.mxu1  ;;  %v941_v2 = vadd.f32 %v1486_v1, %v2058_v25 }
  0xff   : > { %v1488_v32 = vpop.f32.mrf.mxu0 }
 0x100   : > { %v1528_v33 = vpop.f32.mrf.mxu1  ;;  %v2061_v34 = vadd.f32 %v1526_v30, %v941_v2  ;;  %v1489_v35 = vadd.f32 %v1488_v32, %v1487_v28 }
 0x101   : > { %v1490_v37 = vpop.f32.mrf.mxu0  ;;  %v1529_v40 = vadd.f32 %v1528_v33, %v1527_v29 }
 0x102   : > { %v1530_v38 = vpop.f32.mrf.mxu1  ;;  %v944_v39 = vadd.f32 %v1489_v35, %v2058_v25  ;;  %v1037_v41 = vsel %vm1036_vm0, %v2061_v34, 0.0  ;;  %v1069_v42 = vmul.f32 %v2061_v34, %v2061_v34 }
 0x103   : > { %1038 = vadd.xlane.f32.xlu0 %v1037_v41  ;;  %v1491_v43 = vpop.f32.mrf.mxu0 }
 0x104   : > { %v1531_v44 = vpop.f32.mrf.mxu1  ;;  %v2068_v45 = vadd.f32 %v1529_v40, %v944_v39  ;;  %v1492_v46 = vadd.f32 %v1491_v43, %v1490_v37  ;;  %v1077_v55 = vsel %vm1036_vm0, %v1069_v42, 0.0 }
 0x105   : > { %v1493_v49 = vpop.f32.mrf.mxu0  ;;  %v1532_v52 = vadd.f32 %v1531_v44, %v1530_v38 }
 0x106   : > { %v1533_v50 = vpop.f32.mrf.mxu1  ;;  %v949_v51 = vadd.f32 %v1492_v46, %v2058_v25  ;;  %v1070_v56 = vmul.f32 %v2068_v45, %v2068_v45  ;;  %v1040_v6 = vsel %vm1036_vm0, %v2068_v45, 0.0 }
 0x107   : > { %1078 = vadd.xlane.f32.xlu0 %v1077_v55  ;;  %v1494_v61 = vpop.f32.mrf.mxu0 }
 0x108   : > { %v1534_v62 = vpop.f32.mrf.mxu1  ;;  %v2074_v63 = vadd.f32 %v1532_v52, %v949_v51  ;;  %v1495_v0 = vadd.f32 %v1494_v61, %v1493_v49  ;;  %v1080_v3 = vsel %vm1036_vm0, %v1070_v56, 0.0  ;;  %v1739_v56 = vmov 0  }
 0x109   : > { %1081 = vadd.xlane.f32.xlu1 %v1080_v3  ;;  %v1496_v4 = vpop.f32.mrf.mxu0  ;;  %v1535_v14 = vadd.f32 %v1534_v62, %v1533_v50  ;;  %1605 = vset.pattern.permute.xlu0 %v1739_v56 }
 0x10a   : > { %v1536_v5 = vpop.f32.mrf.mxu1  ;;  %v952_v9 = vadd.f32 %v1495_v0, %v2058_v25  ;;  %v1043_v11 = vsel %vm1036_vm0, %v2074_v63, 0.0  ;;  %v1071_v12 = vmul.f32 %v2074_v63, %v2074_v63 }
 0x10b   : > { %1041 = vadd.xlane.f32.xlu0 %v1040_v6  ;;  %v1497_v7 = vpop.f32.mrf.mxu0 }
 0x10c   : > { %v1537_v8 = vpop.f32.mrf.mxu1  ;;  %v1498_v10 = vadd.f32 %v1497_v7, %v1496_v4  ;;  %v2085_v18 = vadd.f32 %v1535_v14, %v952_v9  ;;  %v1083_v47 = vsel %vm1036_vm0, %v1071_v12, 0.0 }
 0x10d   : > { %v1499_v13 = vpop.f32.mrf.mxu0  ;;  %1044 = vadd.xlane.f32.xlu1 %v1043_v11  ;;  %v1538_v16 = vadd.f32 %v1537_v8, %v1536_v5 }
 0x10e   : > { %v1539_v59 = vpop.f32.mrf.mxu1  ;;  %v957_v15 = vadd.f32 %v1498_v10, %v2058_v25  ;;  %v1046_v26 = vsel %vm1036_vm0, %v2085_v18, 0.0  ;;  %v1072_v27 = vmul.f32 %v2085_v18, %v2085_v18 }
 0x10f   : > { %v1500_v60 = vpop.f32.mrf.mxu0 }
 0x110   : > { %v1540_v17 = vpop.f32.mrf.mxu1  ;;  %v2087_v19 = vadd.f32 %v1538_v16, %v957_v15  ;;  %v1501_v20 = vadd.f32 %v1500_v60, %v1499_v13  ;;  %v1086_v38 = vsel %vm1036_vm0, %v1072_v27, 0.0 }
 0x111   : > { %v1502_v21 = vpop.f32.mrf.mxu0  ;;  %1084 = vadd.xlane.f32.xlu1 %v1083_v47  ;;  %v1541_v23 = vadd.f32 %v1540_v17, %v1539_v59 }
 0x112   : > { %v1542_v48 = vpop.f32.mrf.mxu1  ;;  %v960_v22 = vadd.f32 %v1501_v20, %v2058_v25  ;;  %v1049_v53 = vsel %vm1036_vm0, %v2087_v19, 0.0  ;;  %v1073_v39 = vmul.f32 %v2087_v19, %v2087_v19 }
 0x113   : > { %v1503_v57 = vpop.f32.mrf.mxu0  ;;  %1050 = vadd.xlane.f32.xlu0 %v1049_v53 }
 0x114   : > { %v1543_v58 = vpop.f32.mrf.mxu1  ;;  %v2093_v24 = vadd.f32 %v1541_v23, %v960_v22  ;;  %v1504_v54 = vadd.f32 %v1503_v57, %v1502_v21  ;;  %v1089_v44 = vsel %vm1036_vm0, %v1073_v39, 0.0 }
 0x115   : > { %v1505_v1 = vpop.f32.mrf.mxu0  ;;  %1047 = vadd.xlane.f32.xlu1 %v1046_v26  ;;  %v1544_v2 = vadd.f32 %v1543_v58, %v1542_v48 }
 0x116   : > { %v1545_v28 = vpop.f32.mrf.mxu1  ;;  %v965_v29 = vadd.f32 %v1504_v54, %v2058_v25  ;;  %v1052_v30 = vsel %vm1036_vm0, %v2093_v24, 0.0  ;;  %v1074_v46 = vmul.f32 %v2093_v24, %v2093_v24 }
 0x117   : > { %v1506_v32 = vpop.f32.mrf.mxu0  ;;  %1053 = vadd.xlane.f32.xlu0 %v1052_v30 }
 0x118   : > { %v1546_v33 = vpop.f32.mrf.mxu1  ;;  %v2102_v35 = vadd.f32 %v1544_v2, %v965_v29  ;;  %v1507_v37 = vadd.f32 %v1506_v32, %v1505_v1  ;;  %v2134_v1 = vld [vmem:[%s2262_s4] ss:$0 sm:$0xff] }
 0x119   : > { %1087 = vadd.xlane.f32.xlu1 %v1086_v38  ;;  %v1547_v41 = vadd.f32 %v1546_v33, %v1545_v28  ;;  %v2141_v33 = vld [vmem:[%s2263_s5] ss:$0 sm:$0xff] }
 0x11a   : > { %v968_v40 = vadd.f32 %v1507_v37, %v2058_v25  ;;  %v1055_v42 = vsel %vm1036_vm0, %v2102_v35, 0.0  ;;  %v1075_v50 = vmul.f32 %v2102_v35, %v2102_v35  ;;  %v1092_v25 = vsel %vm1036_vm0, %v1074_v46, 0.0 }
 0x11b   : > { %1056 = vadd.xlane.f32.xlu0 %v1055_v42 }
 0x11c   : > { %v2110_v43 = vadd.f32 %v1547_v41, %v968_v40  ;;  %v1095_v52 = vsel %vm1036_vm0, %v1075_v50, 0.0 }
 0x11d   : > { %1090 = vadd.xlane.f32.xlu1 %v1089_v44 }
 0x11e   : > { %v1058_v49 = vsel %vm1036_vm0, %v2110_v43, 0.0  ;;  %v1076_v51 = vmul.f32 %v2110_v43, %v2110_v43 }
 0x11f   : > { %1059 = vadd.xlane.f32.xlu0 %v1058_v49 }
 0x120   : > { %v1098_v55 = vsel %vm1036_vm0, %v1076_v51, 0.0 }
 0x121   : > { %1093 = vadd.xlane.f32.xlu1 %v1092_v25 }
 0x123   : > { %1096 = vadd.xlane.f32.xlu0 %v1095_v52  ;;  %v2155_v52 = vld [vmem:[%s2264_s6] ss:$0 sm:$0xff] }
 0x125   : > { %1099 = vadd.xlane.f32.xlu1 %v1098_v55 }
 0x18c   : > { %v1039_v61 = vpop.xlane.xlu0 %1038 }
 0x18d   : > { %v1061_v62 = vmul.f32 0.015625, %v1039_v61 }
 0x18f   : > { %v1109_v3 = vmul.f32 %v1061_v62, %v1061_v62  ;;  %v1125_v53 = vsub.f32 %v2061_v34, %v1061_v62 }
 0x190   : > { %v1079_v0 = vpop.xlane.xlu0 %1078 }
 0x191   : > { %v1101_v4 = vmul.f32 0.015625, %v1079_v0 }
 0x192   : > { %v1082_v5 = vpop.xlane.xlu1 %1081 }
 0x193   : > { %v1117_v6 = vsub.f32 %v1101_v4, %v1109_v3  ;;  %v1102_v11 = vmul.f32 0.015625, %v1082_v5 }
 0x194   : > { %v1042_v7 = vpop.xlane.xlu0 %1041 }
 0x195   : > { %v1133_v8 = vadd.f32 1e-05, %v1117_v6  ;;  %v1062_v9 = vmul.f32 0.015625, %v1042_v7 }
 0x196   : > { %v1045_v10 = vpop.xlane.xlu1 %1044 }
 0x197   : > { %1644 = vrsqrt.f32 %v1133_v8  ;;  %v1110_v12 = vmul.f32 %v1062_v9, %v1062_v9  ;;  %v1063_v13 = vmul.f32 0.015625, %v1045_v10  ;;  %v1126_v40 = vsub.f32 %v2068_v45, %v1062_v9 }
 0x199   : > { %v1118_v59 = vsub.f32 %v1102_v11, %v1110_v12  ;;  %v1111_v16 = vmul.f32 %v1063_v13, %v1063_v13  ;;  %v1127_v55 = vsub.f32 %v2074_v63, %v1063_v13 }
 0x19a   : > { %v1085_v14 = vpop.xlane.xlu1 %1084 }
 0x19b   : > { %v1134_v15 = vadd.f32 1e-05, %v1118_v59  ;;  %v1103_v60 = vmul.f32 0.015625, %v1085_v14 }
 0x19c   : > { %v1051_v17 = vpop.xlane.xlu0 %1050 }
 0x19d   : > { %1646 = vrsqrt.f32 %v1134_v15  ;;  %v1119_v20 = vsub.f32 %v1103_v60, %v1111_v16  ;;  %v2127_v57 = vmul.f32 0.015625, %v1051_v17 }
 0x19e   : > { %v1048_v47 = vpop.xlane.xlu1 %1047 }
 0x19f   : > { %v1135_v21 = vadd.f32 1e-05, %v1119_v20  ;;  %v2124_v48 = vmul.f32 0.015625, %v1048_v47  ;;  %v1113_v30 = vmul.f32 %v2127_v57, %v2127_v57 }
 0x1a0   : > { %v1054_v22 = vpop.xlane.xlu0 %1053 }
 0x1a1   : > { %1648 = vrsqrt.f32 %v1135_v21  ;;  %v1112_v58 = vmul.f32 %v2124_v48, %v2124_v48  ;;  %v2143_v37 = vmul.f32 0.015625, %v1054_v22  ;;  %v1128_v21 = vsub.f32 %v2085_v18, %v2124_v48 }
 0x1a2   : > { %v1088_v23 = vpop.xlane.xlu1 %1087 }
 0x1a3   : > { %v1104_v54 = vmul.f32 0.015625, %v1088_v23  ;;  %v1114_v45 = vmul.f32 %v2143_v37, %v2143_v37 }
 0x1a4   : > { %v1645_v26 = vpop.eup %1644  ;;  %v1057_v27 = vpop.xlane.xlu0 %1056 }
 0x1a5   : > { %v1120_v28 = vsub.f32 %v1104_v54, %v1112_v58  ;;  %v1149_v29 = vmul.f32 %v1645_v26, %v1125_v53  ;;  %v2147_v41 = vmul.f32 0.015625, %v1057_v27  ;;  %v1129_v26 = vsub.f32 %v2087_v19, %v2127_v57 }
 0x1a6   : > { %v1091_v2 = vpop.xlane.xlu1 %1090 }
 0x1a7   : > { %v1136_v34 = vadd.f32 1e-05, %v1120_v28  ;;  %v1105_v32 = vmul.f32 0.015625, %v1091_v2  ;;  %v1164_v39 = vmul.f32 %v2134_v1, %v1149_v29  ;;  %v1115_v3 = vmul.f32 %v2147_v41, %v2147_v41 }
 0x1a8   : > { %v1060_v38 = vpop.xlane.xlu0 %1059 }
 0x1a9   : > { %1650 = vrsqrt.f32 %v1136_v34  ;;  %v1121_v42 = vsub.f32 %v1105_v32, %v1113_v30  ;;  %v2149_v46 = vmul.f32 0.015625, %v1060_v38  ;;  %v1179_v50 = vadd.f32 %v2141_v33, %v1164_v39 }
 0x1aa   : > { %v1647_v44 = vpop.eup %1646  ;;  %v1094_v49 = vpop.xlane.xlu1 %1093  ;;  %v1130_v34 = vsub.f32 %v2093_v24, %v2143_v37  ;;  %v1131_v38 = vsub.f32 %v2102_v35, %v2147_v41 }
 0x1ab   : > { %v1150_v25 = vmul.f32 %v1647_v44, %v1126_v40  ;;  %v1137_v51 = vadd.f32 1e-05, %v1121_v42  ;;  %v1106_v56 = vmul.f32 0.015625, %v1094_v49  ;;  %v1187_v62 = vmax.f32 %v1179_v50, 0.0 }
 0x1ac   : > { %v1097_v61 = vpop.xlane.xlu0 %1096  ;;  %v1116_v6 = vmul.f32 %v2149_v46, %v2149_v46  ;;  %v1132_v42 = vsub.f32 %v2110_v43, %v2149_v46 }
 0x1ad   : > { %v1165_v0 = vmul.f32 %v2134_v1, %v1150_v25  ;;  %1652 = vrsqrt.f32 %v1137_v51  ;;  %v1107_v4 = vmul.f32 0.015625, %v1097_v61  ;;  %v1122_v7 = vsub.f32 %v1106_v56, %v1114_v45 }
 0x1ae   : > { %v1649_v5 = vpop.eup %1648  ;;  %v1100_v8 = vpop.xlane.xlu1 %1099  ;;  %v1202_v63 = vmul.f32 %v2155_v52, %v1187_v62 }
 0x1af   : > { %v1123_v9 = vsub.f32 %v1107_v4, %v1115_v3  ;;  %v1108_v10 = vmul.f32 0.015625, %v1100_v8  ;;  %v1180_v11 = vadd.f32 %v2141_v33, %v1165_v0  ;;  %v1151_v12 = vmul.f32 %v1649_v5, %v1127_v55 }
 0x1b0   : > { %v1138_v13 = vadd.f32 1e-05, %v1122_v7  ;;  %v1210_v59 = vsel %vm1036_vm0, %v1202_v63, 0.0  ;;  %v1461_v7 = vld [vmem:[#allocation2] ss:$0 sm:$0xff] }
 0x1b1   : > { %v1139_v14 = vadd.f32 1e-05, %v1123_v9  ;;  %v1124_v15 = vsub.f32 %v1108_v10, %v1116_v6  ;;  %1211 = vadd.xlane.f32.xlu0 %v1210_v59  ;;  %v1188_v16 = vmax.f32 %v1180_v11, 0.0  ;;  %v1166_v60 = vmul.f32 %v2134_v1, %v1151_v12 }
 0x1b2   : > { %1654 = vrsqrt.f32 %v1138_v13  ;;  %v1261_v11 = vand.u32 127, %v374_v31 }
 0x1b3   : > { %1656 = vrsqrt.f32 %v1139_v14  ;;  %v1140_v17 = vadd.f32 1e-05, %v1124_v15  ;;  %v1203_v20 = vmul.f32 %v2155_v52, %v1188_v16  ;;  %v1181_v47 = vadd.f32 %v2141_v33, %v1166_v60 }
 0x1b4   : > { %v1264_v59 = vsub.s32 %v1261_v11, %v1949_v36 }
 0x1b5   : > { %1658 = vrsqrt.f32 %v1140_v17  ;;  %v1213_v22 = vsel %vm1036_vm0, %v1203_v20, 0.0  ;;  %v1189_v23 = vmax.f32 %v1181_v47, 0.0 }
 0x1b6   : > { %v1651_v53 = vpop.eup %1650  ;;  %1214 = vadd.xlane.f32.xlu1 %v1213_v22 }
 0x1b7   : > { %v1204_v58 = vmul.f32 %v2155_v52, %v1189_v23  ;;  %v1152_v54 = vmul.f32 %v1651_v53, %v1128_v21 }
 0x1b9   : > { %v1216_v27 = vsel %vm1036_vm0, %v1204_v58, 0.0  ;;  %v1167_v28 = vmul.f32 %v2134_v1, %v1152_v54 }
 0x1ba   : > { %v1653_v29 = vpop.eup %1652  ;;  %1217 = vadd.xlane.f32.xlu0 %v1216_v27 }
 0x1bb   : > { %v1182_v18 = vadd.f32 %v2141_v33, %v1167_v28  ;;  %v1153_v48 = vmul.f32 %v1653_v29, %v1129_v26 }
 0x1bd   : > { %v1190_v2 = vmax.f32 %v1182_v18, 0.0  ;;  %v1168_v30 = vmul.f32 %v2134_v1, %v1153_v48 }
 0x1bf   : > { %v1655_v32 = vpop.eup %1654  ;;  %v1205_v19 = vmul.f32 %v2155_v52, %v1190_v2  ;;  %v1183_v57 = vadd.f32 %v2141_v33, %v1168_v30 }
 0x1c0   : > { %v1657_v39 = vpop.eup %1656  ;;  %v1154_v40 = vmul.f32 %v1655_v32, %v1130_v34 }
 0x1c1   : > { %v1219_v44 = vsel %vm1036_vm0, %v1205_v19, 0.0  ;;  %v1191_v49 = vmax.f32 %v1183_v57, 0.0  ;;  %v1155_v50 = vmul.f32 %v1657_v39, %v1131_v38 }
 0x1c2   : > { %v1659_v25 = vpop.eup %1658  ;;  %1220 = vadd.xlane.f32.xlu1 %v1219_v44  ;;  %v1169_v24 = vmul.f32 %v2134_v1, %v1154_v40 }
 0x1c3   : > { %v1206_v37 = vmul.f32 %v2155_v52, %v1191_v49  ;;  %v1170_v35 = vmul.f32 %v2134_v1, %v1155_v50  ;;  %v1156_v41 = vmul.f32 %v1659_v25, %v1132_v42 }
 0x1c4   : > { %v1184_v51 = vadd.f32 %v2141_v33, %v1169_v24 }
 0x1c5   : > { %v1222_v55 = vsel %vm1036_vm0, %v1206_v37, 0.0  ;;  %v1185_v45 = vadd.f32 %v2141_v33, %v1170_v35  ;;  %v1171_v43 = vmul.f32 %v2134_v1, %v1156_v41 }
 0x1c6   : > { %1223 = vadd.xlane.f32.xlu0 %v1222_v55  ;;  %v1192_v46 = vmax.f32 %v1184_v51, 0.0 }
 0x1c7   : > { %v1193_v56 = vmax.f32 %v1185_v45, 0.0  ;;  %v1186_v61 = vadd.f32 %v2141_v33, %v1171_v43 }
 0x1c8   : > { %v1207_v62 = vmul.f32 %v2155_v52, %v1192_v46 }
 0x1c9   : > { %v1208_v0 = vmul.f32 %v2155_v52, %v1193_v56  ;;  %v1194_v3 = vmax.f32 %v1186_v61, 0.0 }
 0x1ca   : > { %v1225_v4 = vsel %vm1036_vm0, %v1207_v62, 0.0 }
 0x1cb   : > { %1226 = vadd.xlane.f32.xlu1 %v1225_v4  ;;  %v1228_v5 = vsel %vm1036_vm0, %v1208_v0, 0.0  ;;  %v1209_v6 = vmul.f32 %v2155_v52, %v1194_v3 }
 0x1cc   : > { %1229 = vadd.xlane.f32.xlu0 %v1228_v5 }
 0x1cd   : > { %v1231_v1 = vsel %vm1036_vm0, %v1209_v6, 0.0 }
 0x1cf   : > { %1232 = vadd.xlane.f32.xlu1 %v1231_v1 }
 0x1e2   : > { %1241 = vperm.xlu0 %1605, %v1461_v7  }
 0x23a   : > { %v1212_v33 = vpop.xlane.xlu0 %1211 }
 0x23f   : > { %v1215_v63 = vpop.xlane.xlu1 %1214 }
 0x243   : > { %v1218_v8 = vpop.xlane.xlu0 %1217 }
 0x24b   : > { %v1221_v10 = vpop.xlane.xlu1 %1220 }
 0x24f   : > { %v1224_v9 = vpop.xlane.xlu0 %1223 }
 0x254   : > { %v1227_v13 = vpop.xlane.xlu1 %1226 }
 0x255   : > { %v1230_v12 = vpop.xlane.xlu0 %1229 }
 0x258   : > { %v1233_v22 = vpop.xlane.xlu1 %1232 }
 0x25d   : > { %v1242_v52 = vpop.permute.xlu0 %1241 }
 0x25e   : > { %v1244_v14 = vadd.f32 %v1242_v52, %v1212_v33  ;;  %v1245_v15 = vadd.f32 %v1242_v52, %v1215_v63  ;;  %v1246_v16 = vadd.f32 %v1242_v52, %v1218_v8  ;;  %v1247_v60 = vadd.f32 %v1242_v52, %v1221_v10 }
 0x25f   : > { %v1248_v17 = vadd.f32 %v1242_v52, %v1224_v9  ;;  %v1249_v20 = vadd.f32 %v1242_v52, %v1227_v13  ;;  %v1250_v23 = vadd.f32 %v1242_v52, %v1230_v12  ;;  %v1251_v53 = vadd.f32 %v1242_v52, %v1233_v22 }
 0x260   : > { %v1265_v47 = vrot.slane %v1244_v14, %v1264_v59  ;;  %v1269_v31 = vrot.slane %v1245_v15, %v1264_v59  ;;  %v1273_v21 = vrot.slane %v1246_v16, %v1264_v59  ;;  %v1277_v36 = vrot.slane %v1247_v60, %v1264_v59 }
 0x261   : > { %v1281_v54 = vrot.slane %v1248_v17, %v1264_v59  ;;  %v1285_v27 = vrot.slane %v1249_v20, %v1264_v59  ;;  %v1289_v29 = vrot.slane %v1250_v23, %v1264_v59  ;;  %v1293_v48 = vrot.slane %v1251_v53, %v1264_v59 }
 0x262   : > { %v1295_v58 = vsel %vm1294_vm1, %v1269_v31, %v1265_v47 }
 0x263   : > { %v1297_v26 = vsel %vm1296_vm2, %v1273_v21, %v1295_v58 }
 0x264   : > { %v1299_v28 = vsel %vm1298_vm3, %v1277_v36, %v1297_v26 }
 0x265   : > { %v1301_v18 = vsel %vm1300_vm4, %v1281_v54, %v1299_v28 }
 0x266   : > { %v1303_v2 = vsel %vm1302_vm5, %v1285_v27, %v1301_v18 }
 0x267   : > { %v1305_v30 = vsel %vm1304_vm6, %v1289_v29, %v1303_v2 }
 0x268   : > { %v1307_v34 = vsel %vm1306_vm7, %v1293_v48, %v1305_v30 }
 0x269   : > { %1310 = vst.msk [vmem:[%s339_s25] sm:$0xff] %vm1309_vm8, %v1307_v34 }
 0x26a   : > { %1673 = shalt.err (!%p1670_p5)
}
 0x26b   : > { %s1674_s22 = scalar_lea.hbm %s2216_s7, 128  ;;  %s1678_s24 = scalar_lea.hbm %s2266_s8, 256 }
 0x26c   : > { %p1675_p6 = scmp.ne.s32.totalorder %s2216_s7, %s1674_s22  ;;  %p1679_p10 = scmp.lt.s32.totalorder %s2216_s7, %s2266_s8 }
 0x26d   : > { %p1680_p11 = scmp.lt.s32.totalorder %s1678_s24, %s1674_s22 }
 0x26e   : > { %p1676_p7 = pnand %p1675_p6, %p1829_p4 }
 0x26f   : > { %p1681_p12 = por %p1680_p11, %p1679_p10 }
 0x270   : > { %p1677_p9 = pneg %p1676_p7 }
 0x272   : > { %p1682_p13 = pnand %p1681_p12, %p1677_p9 }
 0x274   : > { %1685 = shalt.err (!%p1682_p13)
}
 0x275   : > { %1548 = dma.vmem_to_hbm [thread:$0]  (%p1829_p4), %s1327_s26, 128, %s2216_s7, %s1312_s10  }
 0x276 PF: > { %p1554_p0 = scmp.ge.s32.totalorder %s1736_s12, 2  ;;  %s1338_s28 = sand.u32 1, %s1716_s29  }
 0x277   : > { %s1339_s13 = scalar_lea.sflag [#allocation4], %s1338_s28 }
 0x278   : > { %p1551_p1 = pnand %p1554_p0, %p1836_p8 }
 0x27a   : > { %p1552_p2 = pneg %p1551_p1 }
 0x27c   : > { %1711 = dma.done.wait (%p1552_p2), %s1339_s13, 128  }
 0x27d   : > { %1713 = vsyncadd (%p1552_p2), %s1339_s13, 4294967168  ;;  %s23_s12 = sadd.s32 1, %s1736_s12   ;;  %s2269_s29 = smov %s1720_s30 }
 0x27e   : > { %p20_p3 = scmp.ge.s32.totalorder %s23_s12, 4   ;;  %s2270_s30 = smov %s1724_s9 }
 0x27f   : > { %s2271_s9 = smov %s1842_s19  ;;  %s2272_s10 = smov %s1732_s11 }
 0x280   : > { %s2273_s11 = smov %s2275_s14  ;;  %22 = sbr.rel (!%p20_p3) target bundleno = 7 (0x7), region = 90 }
 0x285   :  { %1344 = vsyncpa [#allocation4], 1 }
 0x286   :  { %1346 = vsyncpa [#allocation4 + $0x1], 1 }

</bundles_post_ra>
